<compile_context>
chip_gen: v6e
topology: v6e:2x2x1
jax: 0.10.0
libtpu: 0.0.40
codegen_flags: <defaults>
</compile_context>

<pallas_src>
import functools

import jax
import jax.numpy as jnp
from jax.experimental import pallas as pl
from jax.experimental.pallas import tpu as pltpu


def _round_up(x: int, m: int) -> int:
    return ((x + m - 1) // m) * m


def _vq_kernel(z_ref, w_ref, esq_ref, zq_ref, idx_ref, loss_ref,
               *, tm: int, n_valid: int, n_embed: int):
    i = pl.program_id(0)

    z = z_ref[...].astype(jnp.float32)           # (TM, D)
    w = w_ref[...].astype(jnp.float32)           # (K, D)

    # scores(n, k) = ||e_k||^2 - 2 * z_n . e_k
    # (same argmin as the euclidean distance used by torch.cdist; the ||z||^2
    #  term is constant per row and the sqrt is monotone, so both are dropped)
    ze = jax.lax.dot_general(
        z, w, dimension_numbers=(((1,), (1,)), ((), ())),
        preferred_element_type=jnp.float32)       # (TM, K)
    scores = esq_ref[...] - 2.0 * ze              # (TM, K)

    # argmin along codes (first occurrence on ties); kept 2D as (TM, 1)
    min_s = jnp.min(scores, axis=-1, keepdims=True)
    col = jax.lax.broadcasted_iota(jnp.int32, scores.shape, 1)
    idx = jnp.min(jnp.where(scores <= min_s, col, n_embed),
                  axis=-1, keepdims=True)         # (TM, 1) int32

    # Gather the selected codebook rows via a one-hot matmul on the MXU.
    # Exactly one 1.0 per row -> the gather is exact in f32.
    onehot = (col == idx).astype(jnp.float32)     # (TM, K)
    zq = jnp.dot(onehot, w, preferred_element_type=jnp.float32)  # (TM, D)

    zq_ref[...] = zq.astype(zq_ref.dtype)
    idx_ref[...] = idx.astype(jnp.int32)

    # Partial sum of (z_q - z_e)^2 over the valid (non-padded) rows of this tile.
    row = jax.lax.broadcasted_iota(jnp.int32, (tm, 1), 0) + i * tm
    valid = row < n_valid                         # (TM, 1)
    d2 = jnp.where(valid, (zq - z) ** 2, 0.0)     # (TM, D)
    part = jnp.sum(d2)

    @pl.when(i == 0)
    def _init():
        loss_ref[0, 0] = 0.0

    loss_ref[0, 0] = loss_ref[0, 0] + part


def quantizer_forward(z_e: jnp.ndarray, codebook: jnp.ndarray, beta: float,
                      *, tm: int = 256):
    """z_e: (B, L, D); codebook: (n_embed, D). Returns (z_q, loss, indices)."""
    B, L, D = z_e.shape
    K, Dw = codebook.shape
    assert Dw == D, "codebook feature dim must match d_model"

    N = B * L
    if N < tm:
        tm = max(8, _round_up(N, 8))
    n_pad = _round_up(N, tm)
    grid = (n_pad // tm,)

    z_flat = z_e.reshape(N, D)
    if n_pad != N:
        z_flat = jnp.pad(z_flat, ((0, n_pad - N), (0, 0)))

    w_f32 = codebook.astype(jnp.float32)
    e_sq = jnp.sum(w_f32 * w_f32, axis=-1)[None, :]      # (1, K)

    kernel = functools.partial(_vq_kernel, tm=tm, n_valid=N, n_embed=K)

    itemsize = jnp.dtype(z_e.dtype).itemsize
    flops = 4 * N * K * D                                # two matmuls ~ 2NKD each
    bytes_accessed = (2 * N * D) * itemsize + (K * D + K) * 4 + N * 4

    zq_pad, idx_pad, loss_sum = pl.pallas_call(
        kernel,
        out_shape=(
            jax.ShapeDtypeStruct((n_pad, D), z_e.dtype),      # quantized rows
            jax.ShapeDtypeStruct((n_pad, 1), jnp.int32),      # code indices
            jax.ShapeDtypeStruct((1, 1), jnp.float32),        # sum of squared diffs
        ),
        grid_spec=pltpu.PrefetchScalarGridSpec(
            num_scalar_prefetch=0,
            grid=grid,
            in_specs=[
                pl.BlockSpec((tm, D), lambda i: (i, 0)),      # z_e row tile
                pl.BlockSpec((K, D), lambda i: (0, 0)),       # whole codebook (resident)
                pl.BlockSpec((1, K), lambda i: (0, 0)),       # ||e_k||^2 (resident)
            ],
            out_specs=(
                pl.BlockSpec((tm, D), lambda i: (i, 0)),
                pl.BlockSpec((tm, 1), lambda i: (i, 0)),
                pl.BlockSpec((1, 1), lambda i: (0, 0),
                             memory_space=pltpu.MemorySpace.SMEM),
            ),
        ),
        compiler_params=pltpu.CompilerParams(
            # loss scalar accumulates across row tiles -> reduction axis
            dimension_semantics=("arbitrary",),
        ),
        cost_estimate=pl.CostEstimate(
            flops=flops, transcendentals=0, bytes_accessed=bytes_accessed),
    )(z_flat, codebook, e_sq)

    z_q = zq_pad[:N].reshape(B, L, D)
    indices = idx_pad[:N, 0].reshape(B, L)

    mse = loss_sum[0, 0] / (N * D)
    loss = (1.0 + beta) * mse        # commitment (beta*mse) + embedding (mse)

    # Straight-through estimator: forward value equals z_q; detach only affects grads.
    z_q_st = z_e + jax.lax.stop_gradient(z_q - z_e)
    return z_q_st, loss, indices


if __name__ == "__main__":
    # Small shapes consistent with the module: batch=2, seq=8, d_model=32.
    B, L, D = 2, 8, 32
    n_embed = 64
    beta = 0.25

    key = jax.random.PRNGKey(0)
    k1, k2 = jax.random.split(key)
    z_e = jax.random.normal(k1, (B, L, D), dtype=jnp.float32)
    codebook = jax.random.uniform(
        k2, (n_embed, D), dtype=jnp.float32,
        minval=-1.0 / n_embed, maxval=1.0 / n_embed)

    z_q, loss, indices = quantizer_forward(z_e, codebook, beta)
    z_q, loss, indices = jax.block_until_ready((z_q, loss, indices))

    # Pure-JAX reference mirroring the PyTorch forward.
    z_flat = z_e.reshape(-1, D)
    dists = jnp.sqrt(
        jnp.sum((z_flat[:, None, :] - codebook[None, :, :]) ** 2, axis=-1))
    idx_ref = jnp.argmin(dists, axis=1)
    z_q_ref = codebook[idx_ref].reshape(B, L, D)
    commitment = beta * jnp.mean((z_q_ref - z_e) ** 2)
    embedding = jnp.mean((z_e - z_q_ref) ** 2)
    loss_ref = commitment + embedding
    z_q_st_ref = z_e + (z_q_ref - z_e)

    assert z_q.shape == (B, L, D) and indices.shape == (B, L)
    assert jnp.array_equal(indices,
                           idx_ref.reshape(B, L).astype(indices.dtype)), "indices mismatch"
    assert jnp.allclose(z_q, z_q_st_ref, atol=1e-5), "z_q mismatch"
    assert jnp.allclose(loss, loss_ref, atol=1e-5, rtol=1e-4), "loss mismatch"

    print("KERNEL_OK")
</pallas_src>

<mosaic_0001>
module attributes {stable_mosaic.version = 11 : i64} {
  func.func @_vq_kernel(%arg0: i32, %arg1: memref<16x32xf32, #tpu.memory_space<vmem>>, %arg2: memref<64x32xf32, #tpu.memory_space<vmem>>, %arg3: memref<1x64xf32, #tpu.memory_space<vmem>>, %arg4: memref<16x32xf32, #tpu.memory_space<vmem>>, %arg5: memref<16x1xi32, #tpu.memory_space<vmem>>, %arg6: memref<1x1xf32, #tpu.memory_space<smem>>) attributes {dimension_semantics = [#tpu.dimension_semantics<arbitrary>], iteration_bounds = array<i64: 1>, scalar_prefetch = 0 : i64, scratch_operands = 0 : i64, tpu.core_type = #tpu.core_type<tc>, window_params = [{transform_indices = @transform_0, window_bounds = array<i64: 16, 32>}, {pipeline_mode = #tpu.pipeline_mode<synchronous>, transform_indices = @transform_1, window_bounds = array<i64: 64, 32>}, {pipeline_mode = #tpu.pipeline_mode<synchronous>, transform_indices = @transform_2, window_bounds = array<i64: 1, 64>}, {transform_indices = @transform_3, window_bounds = array<i64: 16, 32>}, {transform_indices = @transform_4, window_bounds = array<i64: 16, 1>}, {transform_indices = @transform_5, window_bounds = array<i64: 1, 1>}]} {
    %c0 = arith.constant 0 : index
    %c0_0 = arith.constant 0 : index
    %0 = vector.load %arg1[%c0, %c0_0] : memref<16x32xf32, #tpu.memory_space<vmem>>, vector<16x32xf32>
    %c0_1 = arith.constant 0 : index
    %c0_2 = arith.constant 0 : index
    %1 = vector.load %arg2[%c0_1, %c0_2] : memref<64x32xf32, #tpu.memory_space<vmem>>, vector<64x32xf32>
    %cst = arith.constant dense<0.000000e+00> : vector<16x64xf32>
    %2 = tpu.matmul %0, %1, %cst {dimension_numbers = #tpu.dot_dimension_numbers<[1], [1], [0], [0], [0, 0, 1, 0], [], []>} : vector<16x32xf32>, vector<64x32xf32>, vector<16x64xf32> -> vector<16x64xf32>
    %c0_3 = arith.constant 0 : index
    %c0_4 = arith.constant 0 : index
    %3 = vector.load %arg3[%c0_3, %c0_4] : memref<1x64xf32, #tpu.memory_space<vmem>>, vector<1x64xf32>
    %cst_5 = arith.constant 2.000000e+00 : f32
    %4 = vector.broadcast %cst_5 : f32 to vector<16x64xf32>
    %5 = arith.mulf %4, %2 : vector<16x64xf32>
    %6 = vector.broadcast %3 : vector<1x64xf32> to vector<16x64xf32>
    %7 = arith.subf %6, %5 : vector<16x64xf32>
    %cst_6 = arith.constant dense<0x7F800000> : vector<16xf32>
    %8 = vector.multi_reduction <minimumf>, %7, %cst_6 [1] : vector<16x64xf32> to vector<16xf32>
    %9 = vector.shape_cast %8 : vector<16xf32> to vector<16x1xf32>
    %10 = tpu.iota {dimensions = array<i32: 1>} : vector<16x64xi32>
    %11 = vector.broadcast %9 : vector<16x1xf32> to vector<16x64xf32>
    %12 = arith.cmpf ole, %7, %11 : vector<16x64xf32>
    %c64_i32 = arith.constant 64 : i32
    %13 = vector.broadcast %c64_i32 : i32 to vector<16x64xi32>
    %14 = arith.select %12, %10, %13 : vector<16x64xi1>, vector<16x64xi32>
    %cst_7 = arith.constant dense<2147483647> : vector<16xi32>
    %15 = vector.multi_reduction <minsi>, %14, %cst_7 [1] : vector<16x64xi32> to vector<16xi32>
    %16 = vector.shape_cast %15 : vector<16xi32> to vector<16x1xi32>
    %17 = vector.broadcast %16 : vector<16x1xi32> to vector<16x64xi32>
    %18 = arith.cmpi eq, %10, %17 : vector<16x64xi32>
    %19 = arith.extui %18 : vector<16x64xi1> to vector<16x64xi32>
    %20 = arith.sitofp %19 : vector<16x64xi32> to vector<16x64xf32>
    %cst_8 = arith.constant dense<0.000000e+00> : vector<16x32xf32>
    %21 = tpu.matmul %20, %1, %cst_8 {dimension_numbers = #tpu.dot_dimension_numbers<[1], [0], [0], [1], [0, 0, 1, 1], [], []>} : vector<16x64xf32>, vector<64x32xf32>, vector<16x32xf32> -> vector<16x32xf32>
    %c0_9 = arith.constant 0 : index
    %c0_10 = arith.constant 0 : index
    %22 = vector.load %arg4[%c0_9, %c0_10] : memref<16x32xf32, #tpu.memory_space<vmem>>, vector<16x32xf32>
    tpu.vector_store %arg4[%c0_9, %c0_10], %21 {strides = array<i32>} : memref<16x32xf32, #tpu.memory_space<vmem>>, vector<16x32xf32>,
    %c0_11 = arith.constant 0 : index
    %c0_12 = arith.constant 0 : index
    %23 = vector.load %arg5[%c0_11, %c0_12] : memref<16x1xi32, #tpu.memory_space<vmem>>, vector<16x1xi32>
    tpu.vector_store %arg5[%c0_11, %c0_12], %16 {strides = array<i32>} : memref<16x1xi32, #tpu.memory_space<vmem>>, vector<16x1xi32>,
    %24 = tpu.iota {dimensions = array<i32: 0>} : vector<16x1xi32>
    %c16_i32 = arith.constant 16 : i32
    %25 = arith.muli %arg0, %c16_i32 : i32
    %26 = vector.broadcast %25 : i32 to vector<16x1xi32>
    %27 = arith.addi %24, %26 : vector<16x1xi32>
    %c16_i32_13 = arith.constant 16 : i32
    %28 = vector.broadcast %c16_i32_13 : i32 to vector<16x1xi32>
    %29 = arith.cmpi slt, %27, %28 : vector<16x1xi32>
    %30 = arith.subf %21, %0 : vector<16x32xf32>
    %31 = arith.mulf %30, %30 : vector<16x32xf32>
    %cst_14 = arith.constant 0.000000e+00 : f32
    %32 = vector.shape_cast %29 : vector<16x1xi1> to vector<16x1xi1>
    %33 = vector.broadcast %32 : vector<16x1xi1> to vector<16x32xi1>
    %34 = vector.broadcast %cst_14 : f32 to vector<16x32xf32>
    %35 = arith.select %33, %31, %34 : vector<16x32xi1>, vector<16x32xf32>
    %36 = vector.shape_cast %35 : vector<16x32xf32> to vector<1x16x32xf32>
    %cst_15 = arith.constant dense<0.000000e+00> : vector<1xf32>
    %37 = vector.multi_reduction <add>, %36, %cst_15 [1, 2] : vector<1x16x32xf32> to vector<1xf32>
    %38 = vector.shape_cast %37 : vector<1xf32> to vector<1x1x1xf32>
    %39 = vector.extract %38[0, 0, 0] : f32 from vector<1x1x1xf32>
    %c0_i32 = arith.constant 0 : i32
    %40 = arith.cmpi eq, %arg0, %c0_i32 : i32
    %41 = arith.extui %40 : i1 to i32
    %c0_i32_16 = arith.constant 0 : i32
    %42 = arith.cmpi ne, %41, %c0_i32_16 : i32
    scf.if %42 {
      %cst_21 = arith.constant 0.000000e+00 : f32
      %c0_22 = arith.constant 0 : index
      %c0_23 = arith.constant 0 : index
      %46 = memref.load %arg6[%c0_22, %c0_23] : memref<1x1xf32, #tpu.memory_space<smem>>
      memref.store %cst_21, %arg6[%c0_22, %c0_23] : memref<1x1xf32, #tpu.memory_space<smem>>
    } else {
    }
    %c0_17 = arith.constant 0 : index
    %c0_18 = arith.constant 0 : index
    %43 = memref.load %arg6[%c0_17, %c0_18] : memref<1x1xf32, #tpu.memory_space<smem>>
    %44 = arith.addf %43, %39 : f32
    %c0_19 = arith.constant 0 : index
    %c0_20 = arith.constant 0 : index
    %45 = memref.load %arg6[%c0_19, %c0_20] : memref<1x1xf32, #tpu.memory_space<smem>>
    memref.store %44, %arg6[%c0_19, %c0_20] : memref<1x1xf32, #tpu.memory_space<smem>>
    return
  }
  func.func @transform_0(%arg0: i32) -> (i32, i32) {
    %c0_i32 = arith.constant 0 : i32
    %c0_i32_0 = arith.constant 0 : i32
    return %arg0, %c0_i32 : i32, i32
  }
  func.func @transform_1(%arg0: i32) -> (i32, i32) {
    %c0_i32 = arith.constant 0 : i32
    %c0_i32_0 = arith.constant 0 : i32
    %c0_i32_1 = arith.constant 0 : i32
    return %c0_i32, %c0_i32_0 : i32, i32
  }
  func.func @transform_2(%arg0: i32) -> (i32, i32) {
    %c0_i32 = arith.constant 0 : i32
    %c0_i32_0 = arith.constant 0 : i32
    %c0_i32_1 = arith.constant 0 : i32
    return %c0_i32, %c0_i32_0 : i32, i32
  }
  func.func @transform_3(%arg0: i32) -> (i32, i32) {
    %c0_i32 = arith.constant 0 : i32
    %c0_i32_0 = arith.constant 0 : i32
    return %arg0, %c0_i32 : i32, i32
  }
  func.func @transform_4(%arg0: i32) -> (i32, i32) {
    %c0_i32 = arith.constant 0 : i32
    %c0_i32_0 = arith.constant 0 : i32
    return %arg0, %c0_i32 : i32, i32
  }
  func.func @transform_5(%arg0: i32) -> (i32, i32) {
    %c0_i32 = arith.constant 0 : i32
    %c0_i32_0 = arith.constant 0 : i32
    %c0_i32_1 = arith.constant 0 : i32
    return %c0_i32, %c0_i32_0 : i32, i32
  }
}

</mosaic_0001>

<bundles_post_ra>
// kernel: tpu_custom_call.1
= control target key start
LH: loop header
LB: loop body
LE: loop exit
PB: predicated region body
PF: predicated region fallthrough
CT: control target
= control target key end

     0   :  { %11 = vsyncpa [#allocation3], 0  ;;  %vm29_vm0 = vcmask 261120   ;;  %s584_s0 = inlined_call_operand.vmem [shape: f32[16,32], index: 0, kind: input, shape index: {}]   ;;  %s585_s1 = inlined_call_operand.vmem [shape: f32[64,32], index: 1, kind: input, shape index: {}]   ;;  %s586_s2 = inlined_call_operand.vmem [shape: f32[1,64], index: 2, kind: input, shape index: {}]   ;;  %s587_s3 = inlined_call_operand.hbm [shape: f32[16,32], index: 3, kind: output, shape index: {0}]   ;;  %s588_s4 = inlined_call_operand.vmem [shape: s32[16,1], index: 4, kind: output, shape index: {1}]   ;;  %s589_s5 = inlined_call_operand.hbm [shape: f32[1,1], index: 5, kind: output, shape index: {2}]  }
   0x1   :  { %v28_v0 = vld [vmem:[%s585_s1 + $0x38] sm:$0xff]  ;;  %v27_v1 = vld [vmem:[%s585_s1 + $0x30] sm:$0xff]  ;;  %v514_v2 = vld [vmem:[%s584_s0] sm:$0xff] }
   0x2   :  { %390 = vmatprep.subr.msk.mxu0 %vm29_vm0, %v28_v0  ;;  %409 = vmatprep.subr.mxu1 %v28_v0 }
   0x3   :  { %391 = vmatpush3.xpose.msk.msra.mxu0 %vm29_vm0, %v28_v0  ;;  %410 = vmatpush3.msra.mxu1 %v28_v0 }
   0x4   :  { %392 = vmatprep.subr.msk.mxu0 %vm29_vm0, %v27_v1  ;;  %406 = vmatprep.mubr.msk.f32.mxu0 %vm29_vm0, %v514_v2 }
   0x5   :  { %12 = vsyncpa [#allocation4], 0  ;;  %v26_v3 = vld [vmem:[%s585_s1 + $0x28] sm:$0xff]  ;;  %411 = vmatprep.subr.mxu1 %v27_v1  ;;  %v25_v4 = vld [vmem:[%s585_s1 + $0x20] sm:$0xff]  ;;  %vm146_vm1 = vcmask 523264   ;;  %v153_v19 = vlaneseq  ;;  %vm278_vm6 = vcmask 7168  }
   0x6   :  { %412 = vmatpush3.msra.mxu1 %v27_v1  ;;  %v24_v5 = vld [vmem:[%s585_s1 + $0x18] sm:$0xff]  ;;  %v23_v6 = vld [vmem:[%s585_s1 + $0x10] sm:$0xff]  ;;  %v22_v7 = vld [vmem:[%s585_s1 + $0x8] sm:$0xff]  ;;  %v468_v48 = vmov 0.0  }
   0x7   :  { %393 = vmatpush3.xpose.msk.msra.mxu0 %vm29_vm0, %v27_v1  ;;  %413 = vmatprep.subr.mxu1 %v26_v3  ;;  %v21_v8 = vld [vmem:[%s585_s1] sm:$0xff]  ;;  %v553_v9 = vld [vmem:[%s584_s0 + $0x8] sm:$0xff]  ;;  %v154_v20 = vand.u32 127, %v153_v19 }
   0x8   :  { %394 = vmatprep.subr.msk.mxu0 %vm29_vm0, %v26_v3  ;;  %414 = vmatpush3.msra.mxu1 %v26_v3  ;;  %v365_v14 = vld [vmem:[%s586_s2] ss:$0 sm:$0xff] }
   0x9   :  { %415 = vmatprep.subr.mxu1 %v25_v4 }
   0xa   :  { %416 = vmatpush3.msra.mxu1 %v25_v4 }
   0xb   :  { %395 = vmatpush3.xpose.msk.msra.mxu0 %vm29_vm0, %v26_v3  ;;  %417 = vmatprep.subr.mxu1 %v24_v5 }
   0xc   :  { %396 = vmatprep.subr.msk.mxu0 %vm29_vm0, %v25_v4  ;;  %418 = vmatpush3.msra.mxu1 %v24_v5 }
   0xd   :  { %419 = vmatprep.subr.mxu1 %v23_v6 }
   0xe   :  { %420 = vmatpush3.msra.mxu1 %v23_v6 }
   0xf   :  { %397 = vmatpush3.xpose.msk.msra.mxu0 %vm29_vm0, %v25_v4  ;;  %421 = vmatprep.subr.mxu1 %v22_v7 }
  0x10   :  { %398 = vmatprep.subr.msk.mxu0 %vm29_vm0, %v24_v5  ;;  %422 = vmatpush3.msra.mxu1 %v22_v7 }
  0x11   :  { %423 = vmatprep.subr.mxu1 %v21_v8 }
  0x12   :  { %424 = vmatpush3.msra.mxu1 %v21_v8 }
  0x13   :  { %399 = vmatpush3.xpose.msk.msra.mxu0 %vm29_vm0, %v24_v5 }
  0x14   :  { %400 = vmatprep.subr.msk.mxu0 %vm29_vm0, %v23_v6 }
  0x17   :  { %401 = vmatpush3.xpose.msk.msra.mxu0 %vm29_vm0, %v23_v6 }
  0x18   :  { %402 = vmatprep.subr.msk.mxu0 %vm29_vm0, %v22_v7 }
  0x1b   :  { %403 = vmatpush3.xpose.msk.msra.mxu0 %vm29_vm0, %v22_v7 }
  0x1c   :  { %404 = vmatprep.subr.msk.mxu0 %vm29_vm0, %v21_v8 }
  0x1f   :  { %405 = vmatpush3.xpose.msk.msra.mxu0 %vm29_vm0, %v21_v8 }
  0x22   :  { %407 = vmatmul.mubr.msk.f32.vlgmr.msra.gmra.mxu0 %vm29_vm0, %v553_v9 }
  0xe2   :  { %v408_v10 = vpop.f32.mrf.mxu0 }
  0xe3   :  { %v137_v12 = vmul.f32 2.0, %v408_v10 }
  0xe4   :  { %v126_v11 = vpop.f32.mrf.mxu0 }
  0xe5   :  { %v136_v13 = vmul.f32 2.0, %v126_v11  ;;  %v145_v17 = vsub.f32 %v365_v14, %v137_v12 }
  0xe7   :  { %v144_v15 = vsub.f32 %v365_v14, %v136_v13  ;;  %v150_v18 = vsel %vm146_vm1, %v145_v17, inf }
  0xe9   :  { %v147_v16 = vsel %vm146_vm1, %v144_v15, inf }
  0xea   :  { %148 = vmin.xlane.f32.xlu0 %v147_v16 }
  0xee   :  { %151 = vmin.xlane.f32.xlu0 %v150_v18 }
 0x173   :  { %v149_v21 = vpop.xlane.xlu0 %148 }
 0x174   :  { %vm155_vm2 = vcmp.le.f32.partialorder %v144_v15, %v149_v21 }
 0x175   :  { %v157_v22 = vsel %vm155_vm2, %v154_v20, 64 }
 0x176   :  { %v159_v23 = vsel %vm146_vm1, %v157_v22, 2147483647 }
 0x177   :  { %v152_v24 = vpop.xlane.xlu0 %151  ;;  %v161_v25 = vshra.s32 %v159_v23, 16  ;;  %v160_v31 = vand.u32 65535, %v159_v23 }
 0x178   :  { %vm156_vm3 = vcmp.le.f32.partialorder %v145_v17, %v152_v24 }
 0x179   :  { %v158_v26 = vsel %vm156_vm3, %v154_v20, 64  ;;  %v163_v27 = vcvt.s32.f32 %v161_v25  ;;  %v162_v33 = vcvt.s32.f32 %v160_v31 }
 0x17a   :  { %v174_v28 = vsel %vm146_vm1, %v158_v26, 2147483647 }
 0x17b   :  { %164 = vmin.xlane.f32.xlu1 %v163_v27  ;;  %v176_v29 = vshra.s32 %v174_v28, 16  ;;  %v175_v34 = vand.u32 65535, %v174_v28 }
 0x17d   :  { %v178_v30 = vcvt.s32.f32 %v176_v29  ;;  %v177_v37 = vcvt.s32.f32 %v175_v34 }
 0x17f   :  { %179 = vmin.xlane.f32.xlu1 %v178_v30 }
 0x204   :  { %v165_v32 = vpop.xlane.xlu1 %164 }
 0x205   :  { %vm166_vm4 = vcmp.eq.f32.partialorder %v163_v27, %v165_v32  ;;  %v171_v39 = vcvt.f32.s32 %v165_v32 }
 0x206   :  { %v167_v35 = vsel %vm166_vm4, %v162_v33, inf }
 0x207   :  { %168 = vmin.xlane.f32.xlu0 %v167_v35  ;;  %v172_v41 = vshll.u32 %v171_v39, 16 }
 0x208   :  { %v180_v36 = vpop.xlane.xlu1 %179 }
 0x209   :  { %vm181_vm5 = vcmp.eq.f32.partialorder %v178_v30, %v180_v36  ;;  %v186_v42 = vcvt.f32.s32 %v180_v36 }
 0x20a   :  { %v182_v38 = vsel %vm181_vm5, %v177_v37, inf }
 0x20b   :  { %183 = vmin.xlane.f32.xlu1 %v182_v38  ;;  %v187_v46 = vshll.u32 %v186_v42, 16 }
 0x290   :  { %v169_v40 = vpop.xlane.xlu0 %168 }
 0x291   :  { %v170_v43 = vcvt.f32.s32 %v169_v40 }
 0x293   :  { %v173_v44 = vadd.s32 %v172_v41, %v170_v43 }
 0x294   :  { %v184_v45 = vpop.xlane.xlu1 %183 }
 0x295   :  { %279 = vst.msk [vmem:[%s588_s4] sm:$0xff] %vm278_vm6, %v173_v44  ;;  %v185_v47 = vcvt.f32.s32 %v184_v45  ;;  %vm189_vm7 = vcmp.eq.s32.totalorder %v154_v20, %v173_v44 }
 0x296   :  { %v366_v49 = vsel %vm189_vm7, 1.0, %v468_v48 }
 0x297   :  { %v188_v50 = vadd.s32 %v187_v46, %v185_v47  ;;  %425 = vmatprep.mubr.msk.f32.mxu1 %vm146_vm1, %v366_v49 }
 0x299   :  { %280 = vst.msk [vmem:[%s588_s4 + $0x8] sm:$0xff] %vm278_vm6, %v188_v50  ;;  %vm190_vm8 = vcmp.eq.s32.totalorder %v154_v20, %v188_v50  ;;  %s469_s4 = smov [#allocation2]  }
 0x29a   :  { %v367_v51 = vsel %vm190_vm8, 1.0, %v468_v48  ;;  %s327_s16 = sshll.u32 %s469_s4, 4  ;;  %s328_s16 = int_to_ptr.vmem [resolvable:$true] %s327_s16 }
 0x29b   :  { %426 = vmatmul.mubr.msk.f32.vlgmr.msra.gmra.mxu1 %vm146_vm1, %v367_v51  ;;  %s436_s17 = scalar_lea.vmem %s328_s16, 256  ;;  %p441_p1 = scmp.lt.s32.totalorder %s328_s16, %s328_s16 }
 0x29c   :  { %p437_p0 = scmp.ne.s32.totalorder %s328_s16, %s436_s17  ;;  %p442_p2 = scmp.lt.s32.totalorder %s436_s17, %s436_s17 }
 0x29e   :  { %p443_p3 = por %p442_p2, %p441_p1 }
 0x2a0   :  { %p444_p4 = pnand %p443_p3, %p437_p0 }
 0x35b   :  { %v427_v52 = vpop.f32.mrf.mxu1 }
 0x35c   :  { %277 = vst.msk [vmem:[#allocation2 + $0x8] sm:$0xff] %vm29_vm0, %v427_v52  ;;  %v291_v53 = vsub.f32 %v427_v52, %v553_v9 }
 0x35d   :  { %v267_v54 = vpop.f32.mrf.mxu1 }
 0x35e   :  { %v293_v55 = vmul.f32 %v291_v53, %v291_v53  ;;  %276 = vst.msk [vmem:[#allocation2] sm:$0xff] %vm29_vm0, %v267_v54  ;;  %v290_v56 = vsub.f32 %v267_v54, %v514_v2 }
 0x360   :  { %v292_v57 = vmul.f32 %v290_v56, %v290_v56  ;;  %v301_v59 = vsel %vm29_vm0, %v293_v55, 0.0 }
 0x362   :  { %v300_v58 = vsel %vm29_vm0, %v292_v57, 0.0 }
 0x363   :  { %v302_v60 = vadd.f32 %v301_v59, %v300_v58 }
 0x365   :  { %303 = vadd.xlane.f32.xlu0 %v302_v60 }
 0x366   :  { %447 = shalt.err (!%p444_p4)
}
 0x367   :  { %s470_s18 = smov 128   ;;  %s471_s19 = smov 8  }
 0x368   :  { %333 = dma.vmem_to_hbm [thread:$0]  %s328_s16, 256, %s587_s3, [#allocation3], %s470_s18, %s470_s18, %s471_s19  }
 0x369   :  { %s472_s23 = smov [#allocation5]  }
 0x3ee   :  { %v304_v61 = vpop.xlane.xlu0 %303 }
 0x3ef   :  { %v305_v62 = vrot.slane %v304_v61, 4 }
 0x3f1   :  { %v306_v63 = vadd.f32 %v305_v62, %v304_v61 }
 0x3f3   :  { %v307_v0 = vrot.slane %v306_v63, 2 }
 0x3f5   :  { %v308_v1 = vadd.f32 %v307_v0, %v306_v63 }
 0x3f7   :  { %v309_v2 = vrot.slane %v308_v1, 1 }
 0x3f9   :  { %v310_v3 = vadd.f32 %v309_v2, %v308_v1 }
 0x3fb   :  { %428 = vpush %v310_v3 }
 0x42c   :  { %s429_s22 = spop %428 }
 0x42d   :  { %321 = sst [smem:[#allocation5]] %s429_s22 }
 0x42e   :  { %343 = dma.smem_to_hbm %s472_s23, 16, %s589_s5, [#allocation4]  }
 0x42f   :  { %464 = dma.done.wait [#allocation3], 256  }
 0x430   :  { %465 = vsyncadd [#allocation3], 4294967040 }
 0x431   :  { %466 = dma.done.wait [#allocation4], 16  }
 0x432   :  { %467 = vsyncadd [#allocation4], 4294967280 }
 0x433   :  { %352 = sfence }
 0x434   :  { %353 = vsyncpa [#allocation3], 1 }
 0x435   :  { %354 = vsyncpa [#allocation4], 1 }

</bundles_post_ra>
